<compile_context>
chip_gen: v7x
topology: tpu7x:2x2x1
jax: 0.10.0
libtpu: 0.0.40
codegen_flags: <defaults>
</compile_context>

<pallas_src>
import functools

import jax
import jax.numpy as jnp
from jax.experimental import pallas as pl
from jax.experimental.pallas import tpu as pltpu

BN_EPS = 1e-5
_STAT_ROWS = 8  # sublane-aligned ones block used for MXU column sums


def tf_unit_kernel(x_hbm_ref, w_ref, gamma_ref, beta_ref, o_ref, seed_sem,
                   *, apply_bf16):
    """One grid step == one TFUnit applied in place to the resident bf16 tile.

    x_hbm_ref : (M, C) bf16  network input, left in HBM (read once at unit 0)
    w_ref     : (C, C) bf16  conv 1x1 weight, (C_in, C_out) ordered
    gamma_ref : (1, C) f32   BN weight
    beta_ref  : (1, C) f32   BN bias
    o_ref     : (M, C) bf16  resident buffer carrying activations between units
    seed_sem  : DMA semaphore for the one-time seed copy
    """
    u = pl.program_id(0)

    # Unit 0 seeds the resident activation buffer directly from HBM (one DMA,
    # no second resident (M,C) slab).
    @pl.when(u == 0)
    def _():
        cp = pltpu.make_async_copy(x_hbm_ref, o_ref, seed_sem)
        cp.start()
        cp.wait()

    xin = o_ref[...]  # (M, C) bf16 resident activations

    # --- Conv2d(C, C, kernel_size=1): per-pixel channel mixing on the MXU ---
    # bf16 operands fed straight from the resident carry, f32 accumulation.
    # The conv bias is omitted: training-mode BN's mean subtraction cancels
    # any per-channel bias exactly.
    y = jnp.dot(xin, w_ref[...], preferred_element_type=jnp.float32)

    # --- BatchNorm2d (training mode): biased per-channel stats over M -------
    # Column sums offloaded to the MXU (which has large slack at C=128) via a
    # sublane-aligned ones block; f32 accumulation protects the variance.
    m = y.shape[0]
    ones_rows = jnp.ones((_STAT_ROWS, m), jnp.float32)
    s1 = jnp.dot(ones_rows, y, preferred_element_type=jnp.float32)[0:1, :]
    s2 = jnp.dot(ones_rows, y * y, preferred_element_type=jnp.float32)[0:1, :]
    inv_m = 1.0 / m
    mu = s1 * inv_m
    var = jnp.maximum(s2 * inv_m - mu * mu, 0.0)

    # Fused affine: y_norm = y * scale + shift, then ReLU.
    scale = gamma_ref[...] * jax.lax.rsqrt(var + BN_EPS)   # (1, C) f32
    shift = beta_ref[...] - mu * scale                      # (1, C) f32

    if apply_bf16:
        # v6e / v7x: bf16-native VALU -> packed elementwise apply.
        o_ref[...] = jnp.maximum(
            y.astype(jnp.bfloat16) * scale.astype(jnp.bfloat16)
            + shift.astype(jnp.bfloat16),
            0.0)
    else:
        # v5e and older: no bf16 VALU; do the math in f32 and store bf16.
        o_ref[...] = jnp.maximum(y * scale + shift, 0.0).astype(o_ref.dtype)


def _bf16_valu_available():
    """True on chips with a bf16-native VALU (v6e / v7x); False on <= v5."""
    try:
        kind = jax.devices()[0].device_kind.lower()
    except Exception:
        return False
    return not any(g in kind for g in ("v2", "v3", "v4", "v5"))


def _vmem_capacity_bytes():
    try:
        return int(pltpu.get_tpu_info().vmem_capacity_bytes)
    except Exception:
        return 64 * 1024 * 1024  # conservative default: v7x per-TC VMEM


def tfnet_forward_pixels(x2d, w_stack, gamma_stack, beta_stack):
    """Transpose-free entry point.

    x2d         : (M, C) activations (any float dtype; cast to bf16 inside)
    w_stack     : (U, C, C) conv weights in (C_in, C_out) order
    gamma/beta  : (U, 1, C) BN affine parameters
    Returns (M, C) bfloat16.
    """
    M, C = x2d.shape
    U = w_stack.shape[0]

    x_bf16 = x2d.astype(jnp.bfloat16)
    w_bf16 = w_stack.astype(jnp.bfloat16)
    gamma_f32 = gamma_stack.astype(jnp.float32)
    beta_f32 = beta_stack.astype(jnp.float32)

    # --- generation-aware VMEM budget ------------------------------------
    bf16_b, f32_b = 2, 4
    vmem_needed = (
        M * C * bf16_b                 # o_ref: resident bf16 activations
        + M * C * f32_b                # y    : f32 conv result
        + M * C * f32_b                # y*y  : live alongside y for s2 matmul
        + M * C * bf16_b               # bf16 apply temp / cast of y
        + _STAT_ROWS * M * f32_b       # ones block for MXU column sums
        + 2 * C * C * bf16_b * 2       # conv weights, double-buffered
        + 2 * 8 * C * f32_b * 2 * 2    # gamma/beta (sublane-padded), dbl-buffered
    )
    vmem_cap = _vmem_capacity_bytes()
    vmem_limit = int(min(max(2 * vmem_needed, 16 * 1024 * 1024),
                         (vmem_cap * 4) // 5))
    if vmem_needed > vmem_limit:
        # TODO(synk): engage the M-tiled two-pass BN fallback here instead of
        # failing (resident design is preferred below the VMEM ceiling).
        raise NotImplementedError(
            f"resident (M={M}, C={C}) activations need ~{vmem_needed} bytes of "
            f"VMEM, above the {vmem_limit}-byte budget; M-tiled fallback is "
            "not implemented")

    kernel = functools.partial(tf_unit_kernel,
                               apply_bf16=_bf16_valu_available())

    return pl.pallas_call(
        kernel,
        out_shape=jax.ShapeDtypeStruct((M, C), jnp.bfloat16),
        grid_spec=pltpu.PrefetchScalarGridSpec(
            num_scalar_prefetch=0,
            grid=(U,),
            in_specs=[
                pl.BlockSpec(memory_space=pl.ANY),                 # x (HBM)
                pl.BlockSpec((None, C, C), lambda u: (u, 0, 0)),   # w[u]
                pl.BlockSpec((None, 1, C), lambda u: (u, 0, 0)),   # gamma[u]
                pl.BlockSpec((None, 1, C), lambda u: (u, 0, 0)),   # beta[u]
            ],
            out_specs=pl.BlockSpec((M, C), lambda u: (0, 0)),      # resident
            scratch_shapes=[pltpu.SemaphoreType.DMA(())],
        ),
        compiler_params=pltpu.CompilerParams(
            dimension_semantics=("arbitrary",),  # units are sequential
            vmem_limit_bytes=vmem_limit,
        ),
    )(x_bf16, w_bf16, gamma_f32, beta_f32)


def tfnet_forward(x_nchw, w_stack, gamma_stack, beta_stack):
    """NCHW wrapper matching the PyTorch module.  x_nchw: (N, C, H, W).
    Returns (N, C, H, W) float32."""
    N, C, H, W = x_nchw.shape
    M = N * H * W
    # Glue transposes (one full-HBM pass each way); callers that already hold
    # NHWC / (M, C) activations should call tfnet_forward_pixels directly.
    x2d = jnp.transpose(x_nchw, (0, 2, 3, 1)).reshape(M, C)
    out2d = tfnet_forward_pixels(x2d, w_stack, gamma_stack, beta_stack)
    return jnp.transpose(out2d.astype(jnp.float32).reshape(N, H, W, C),
                         (0, 3, 1, 2))


def tfnet_reference(x_nchw, w_stack, b_stack, gamma_stack, beta_stack):
    """Pure-JAX f32 reference faithful to the PyTorch module (including the
    conv bias and two-pass BN stats)."""
    N, C, H, W = x_nchw.shape
    x = jnp.transpose(x_nchw, (0, 2, 3, 1)).reshape(N * H * W, C)
    for u in range(w_stack.shape[0]):
        y = x @ w_stack[u] + b_stack[u]
        mu = jnp.mean(y, axis=0, keepdims=True)
        var = jnp.mean((y - mu) ** 2, axis=0, keepdims=True)
        y = (y - mu) / jnp.sqrt(var + BN_EPS) * gamma_stack[u] + beta_stack[u]
        x = jnp.maximum(y, 0.0)
    return jnp.transpose(x.reshape(N, H, W, C), (0, 3, 1, 2))


def init_params(key, num_units, embed_dim):
    """Deterministic synthetic init (kaiming-like conv weight, nonzero conv
    bias, BN gamma=1 beta=0).  The bias is only used by the f32 reference; the
    kernel drops it (mathematically cancelled by training-mode BN)."""
    ws, bs, gs, betas = [], [], [], []
    for _ in range(num_units):
        key, k_w, k_b = jax.random.split(key, 3)
        # PyTorch conv weight is (C_out, C_in, 1, 1); store transposed
        # (C_in, C_out) so that y = x @ w.
        w = jax.random.normal(k_w, (embed_dim, embed_dim), jnp.float32)
        w = w * jnp.sqrt(2.0 / embed_dim)
        ws.append(w.T)
        bs.append(jax.random.uniform(k_b, (1, embed_dim), jnp.float32,
                                     minval=-0.1, maxval=0.1))
        gs.append(jnp.ones((1, embed_dim), jnp.float32))
        betas.append(jnp.zeros((1, embed_dim), jnp.float32))
    return (jnp.stack(ws), jnp.stack(bs), jnp.stack(gs), jnp.stack(betas))


if __name__ == "__main__":
    # Small shapes consistent with TFNet(num_tf_unit=2,
    #   tf_unit_opt={'type': 'TFUnit', 'Embed_dim': 128, 'kernel_size': 1})
    N, C, H, W = 2, 128, 8, 8
    NUM_UNITS = 2

    key = jax.random.PRNGKey(0)
    key, k_x, k_p = jax.random.split(key, 3)
    x = jax.random.normal(k_x, (N, C, H, W), jnp.float32)
    w_stack, b_stack, g_stack, beta_stack = init_params(k_p, NUM_UNITS, C)

    run = jax.jit(tfnet_forward)
    out = jax.block_until_ready(run(x, w_stack, g_stack, beta_stack))

    ref = tfnet_reference(x, w_stack, b_stack, g_stack, beta_stack)
    assert out.shape == (N, C, H, W)
    assert out.dtype == jnp.float32
    # Tolerance accounts for the bf16 resident carry / bf16 matmul operands /
    # one-pass BN statistics vs the pure-f32 two-pass reference.
    assert jnp.allclose(out, ref, atol=5e-2, rtol=1e-1), "mismatch vs reference"

    print("KERNEL_OK")
</pallas_src>

<mosaic_0001>
module attributes {stable_mosaic.version = 11 : i64} {
  func.func @tf_unit_kernel(%arg0: i32, %arg1: memref<128x128xbf16, #tpu.memory_space<any>>, %arg2: memref<1x128x128xbf16, #tpu.memory_space<vmem>>, %arg3: memref<1x1x128xf32, #tpu.memory_space<vmem>>, %arg4: memref<1x1x128xf32, #tpu.memory_space<vmem>>, %arg5: memref<128x128xbf16, #tpu.memory_space<vmem>>, %arg6: memref<!tpu.dma_semaphore, #tpu.memory_space<semaphore_mem>>) attributes {dimension_semantics = [#tpu.dimension_semantics<arbitrary>], iteration_bounds = array<i64: 2>, scalar_prefetch = 0 : i64, scratch_operands = 1 : i64, tpu.core_type = #tpu.core_type<tc>, window_params = [{}, {transform_indices = @transform_1, window_bounds = array<i64: 1, 128, 128>}, {transform_indices = @transform_2, window_bounds = array<i64: 1, 1, 128>}, {transform_indices = @transform_3, window_bounds = array<i64: 1, 1, 128>}, {pipeline_mode = #tpu.pipeline_mode<synchronous>, transform_indices = @transform_4, window_bounds = array<i64: 128, 128>}]} {
    %c0_i32 = arith.constant 0 : i32
    %0 = arith.cmpi eq, %arg0, %c0_i32 : i32
    %1 = arith.extui %0 : i1 to i32
    %c0_i32_0 = arith.constant 0 : i32
    %2 = arith.cmpi ne, %1, %c0_i32_0 : i32
    scf.if %2 {
      tpu.enqueue_dma source(%arg1 : memref<128x128xbf16, #tpu.memory_space<any>>) target(%arg5 : memref<128x128xbf16, #tpu.memory_space<vmem>>) target_semaphore(%arg6 : memref<!tpu.dma_semaphore, #tpu.memory_space<semaphore_mem>>)
      tpu.wait_dma2 semaphore(%arg6 : memref<!tpu.dma_semaphore, #tpu.memory_space<semaphore_mem>>) src(%arg1 : memref<128x128xbf16, #tpu.memory_space<any>>) dst(%arg5 : memref<128x128xbf16, #tpu.memory_space<vmem>>)
    } else {
    }
    %c0 = arith.constant 0 : index
    %c0_1 = arith.constant 0 : index
    %3 = vector.load %arg5[%c0, %c0_1] : memref<128x128xbf16, #tpu.memory_space<vmem>>, vector<128x128xbf16>
    %c0_2 = arith.constant 0 : index
    %c0_3 = arith.constant 0 : index
    %c0_4 = arith.constant 0 : index
    %4 = vector.load %arg2[%c0_2, %c0_3, %c0_4] : memref<1x128x128xbf16, #tpu.memory_space<vmem>>, vector<1x128x128xbf16>
    %5 = vector.shape_cast %4 : vector<1x128x128xbf16> to vector<128x128xbf16>
    %cst = arith.constant dense<0.000000e+00> : vector<128x128xf32>
    %6 = tpu.matmul %3, %5, %cst {dimension_numbers = #tpu.dot_dimension_numbers<[1], [0], [0], [1], [0, 0, 1, 1], [], []>} : vector<128x128xbf16>, vector<128x128xbf16>, vector<128x128xf32> -> vector<128x128xf32>
    %cst_5 = arith.constant 1.000000e+00 : f32
    %7 = vector.broadcast %cst_5 : f32 to vector<8x128xf32>
    %cst_6 = arith.constant dense<0.000000e+00> : vector<8x128xf32>
    %8 = tpu.matmul %7, %6, %cst_6 {dimension_numbers = #tpu.dot_dimension_numbers<[1], [0], [0], [1], [0, 0, 1, 1], [], []>} : vector<8x128xf32>, vector<128x128xf32>, vector<8x128xf32> -> vector<8x128xf32>
    %9 = vector.extract_strided_slice %8 {offsets = [0, 0], sizes = [1, 128], strides = [1, 1]} : vector<8x128xf32> to vector<1x128xf32>
    %10 = arith.mulf %6, %6 : vector<128x128xf32>
    %cst_7 = arith.constant dense<0.000000e+00> : vector<8x128xf32>
    %11 = tpu.matmul %7, %10, %cst_7 {dimension_numbers = #tpu.dot_dimension_numbers<[1], [0], [0], [1], [0, 0, 1, 1], [], []>} : vector<8x128xf32>, vector<128x128xf32>, vector<8x128xf32> -> vector<8x128xf32>
    %12 = vector.extract_strided_slice %11 {offsets = [0, 0], sizes = [1, 128], strides = [1, 1]} : vector<8x128xf32> to vector<1x128xf32>
    %cst_8 = arith.constant 7.812500e-03 : f32
    %13 = vector.broadcast %cst_8 : f32 to vector<1x128xf32>
    %14 = arith.mulf %9, %13 : vector<1x128xf32>
    %cst_9 = arith.constant 7.812500e-03 : f32
    %15 = vector.broadcast %cst_9 : f32 to vector<1x128xf32>
    %16 = arith.mulf %12, %15 : vector<1x128xf32>
    %17 = arith.mulf %14, %14 : vector<1x128xf32>
    %18 = arith.subf %16, %17 : vector<1x128xf32>
    %cst_10 = arith.constant 0.000000e+00 : f32
    %19 = vector.broadcast %cst_10 : f32 to vector<1x128xf32>
    %20 = arith.maximumf %18, %19 : vector<1x128xf32>
    %c0_11 = arith.constant 0 : index
    %c0_12 = arith.constant 0 : index
    %c0_13 = arith.constant 0 : index
    %21 = vector.load %arg3[%c0_11, %c0_12, %c0_13] : memref<1x1x128xf32, #tpu.memory_space<vmem>>, vector<1x1x128xf32>
    %22 = vector.shape_cast %21 : vector<1x1x128xf32> to vector<1x128xf32>
    %cst_14 = arith.constant 9.99999974E-6 : f32
    %23 = vector.broadcast %cst_14 : f32 to vector<1x128xf32>
    %24 = arith.addf %20, %23 : vector<1x128xf32>
    %25 = math.rsqrt %24 : vector<1x128xf32>
    %26 = arith.mulf %22, %25 : vector<1x128xf32>
    %c0_15 = arith.constant 0 : index
    %c0_16 = arith.constant 0 : index
    %c0_17 = arith.constant 0 : index
    %27 = vector.load %arg4[%c0_15, %c0_16, %c0_17] : memref<1x1x128xf32, #tpu.memory_space<vmem>>, vector<1x1x128xf32>
    %28 = vector.shape_cast %27 : vector<1x1x128xf32> to vector<1x128xf32>
    %29 = arith.mulf %14, %26 : vector<1x128xf32>
    %30 = arith.subf %28, %29 : vector<1x128xf32>
    %31 = arith.truncf %6 : vector<128x128xf32> to vector<128x128xbf16>
    %32 = arith.truncf %26 : vector<1x128xf32> to vector<1x128xbf16>
    %33 = vector.broadcast %32 : vector<1x128xbf16> to vector<128x128xbf16>
    %34 = arith.mulf %31, %33 : vector<128x128xbf16>
    %35 = arith.truncf %30 : vector<1x128xf32> to vector<1x128xbf16>
    %36 = vector.broadcast %35 : vector<1x128xbf16> to vector<128x128xbf16>
    %37 = arith.addf %34, %36 : vector<128x128xbf16>
    %cst_18 = arith.constant 0.000000e+00 : bf16
    %38 = vector.broadcast %cst_18 : bf16 to vector<128x128xbf16>
    %39 = arith.maximumf %37, %38 : vector<128x128xbf16>
    %c0_19 = arith.constant 0 : index
    %c0_20 = arith.constant 0 : index
    %40 = vector.load %arg5[%c0_19, %c0_20] : memref<128x128xbf16, #tpu.memory_space<vmem>>, vector<128x128xbf16>
    tpu.vector_store %arg5[%c0_19, %c0_20], %39 {strides = array<i32>} : memref<128x128xbf16, #tpu.memory_space<vmem>>, vector<128x128xbf16>,
    return
  }
  func.func @transform_1(%arg0: i32) -> (i32, i32, i32) {
    %c0_i32 = arith.constant 0 : i32
    %c0_i32_0 = arith.constant 0 : i32
    %c0_i32_1 = arith.constant 0 : i32
    return %arg0, %c0_i32, %c0_i32_0 : i32, i32, i32
  }
  func.func @transform_2(%arg0: i32) -> (i32, i32, i32) {
    %c0_i32 = arith.constant 0 : i32
    %c0_i32_0 = arith.constant 0 : i32
    %c0_i32_1 = arith.constant 0 : i32
    return %arg0, %c0_i32, %c0_i32_0 : i32, i32, i32
  }
  func.func @transform_3(%arg0: i32) -> (i32, i32, i32) {
    %c0_i32 = arith.constant 0 : i32
    %c0_i32_0 = arith.constant 0 : i32
    %c0_i32_1 = arith.constant 0 : i32
    return %arg0, %c0_i32, %c0_i32_0 : i32, i32, i32
  }
  func.func @transform_4(%arg0: i32) -> (i32, i32) {
    %c0_i32 = arith.constant 0 : i32
    %c0_i32_0 = arith.constant 0 : i32
    %c0_i32_1 = arith.constant 0 : i32
    return %c0_i32, %c0_i32_0 : i32, i32
  }
}

</mosaic_0001>

<bundles_post_ra>
// kernel: tfnet_forward.1
= control target key start
LH: loop header
LB: loop body
LE: loop exit
PB: predicated region body
PF: predicated region fallthrough
CT: control target
= control target key end

     0   :  { %s1137_s15 = smov 0   ;;  %s1342_s0 = inlined_call_operand.vmem [shape: bf16[128,128], index: 0, kind: input, shape index: {}]   ;;  %s1343_s1 = inlined_call_operand.vmem [shape: bf16[2,128,128], index: 1, kind: input, shape index: {}]   ;;  %s1344_s2 = inlined_call_operand.vmem [shape: f32[2,1,128], index: 2, kind: input, shape index: {}]   ;;  %s1345_s3 = inlined_call_operand.vmem [shape: f32[2,1,128], index: 3, kind: input, shape index: {}]   ;;  %s1346_s4 = inlined_call_operand.vmem [shape: bf16[128,128], index: 4, kind: output, shape index: {}]  }
   0x1 LB: > { %s823_s16 = sadd.s32 4294967295, %s1105_s15   ;;  %p826_p0 = scmp.ge.s32.totalorder %s1105_s15, 1  ;;  %s1105_s15 = sphi %s1137_s15, %s14_s15  }
   0x2   : > { %p149_p1 = scmp.lt.s32.totalorder %s1105_s15, 3 }
   0x4   : > { %p150_p2 = pnand %p826_p0, %p149_p1 }
   0x5   : > { %p174_p3 = scmp.lt.s32.totalorder (!%p150_p2), %s823_s16, 1  ;;  %p829_p4 = scmp.ne.s32.totalorder (!%p150_p2), %s823_s16, 0 }
   0x6   : > { %153 = sbr.rel (%p150_p2) target bundleno = 565 (0x235), region = 32 }
   0xd   : > { %s1145_s17 = scalar_select %p174_p3, %s823_s16, 1 }
   0xe   : > { %189 = sbr.rel (%p829_p4) target bundleno = 24 (0x18), region = 36  ;;  %v222_v0 = vld [vmem:[%s1342_s0] sm:$0xff] (!%p829_p4)  ;;  %v224_v1 = vld [vmem:[%s1342_s0 + $0x8] sm:$0xff] (!%p829_p4)  ;;  %v226_v2 = vld [vmem:[%s1342_s0 + $0x10] sm:$0xff] (!%p829_p4) }
   0xf   : > { %s865_s18 = sshll.u32 %s1145_s17, 6  ;;  %s181_s21 = scalar_lea.vmem %s1344_s2, %s1145_s17  ;;  %223 = vst [vmem:[%s1346_s4] sm:$0xff] (!%p829_p4), %v222_v0  ;;  %225 = vst [vmem:[%s1346_s4 + $0x8] sm:$0xff] (!%p829_p4), %v224_v1  ;;  %v228_v3 = vld [vmem:[%s1342_s0 + $0x18] sm:$0xff] (!%p829_p4)  ;;  %v230_v4 = vld [vmem:[%s1342_s0 + $0x20] sm:$0xff] (!%p829_p4) }
  0x10   : > { %s1155_s24 = scalar_lea.vmem %s1343_s1, %s865_s18  ;;  %s184_s27 = scalar_lea.vmem %s1345_s3, %s1145_s17  ;;  %227 = vst [vmem:[%s1346_s4 + $0x10] sm:$0xff] (!%p829_p4), %v226_v2  ;;  %v232_v5 = vld [vmem:[%s1342_s0 + $0x28] sm:$0xff] (!%p829_p4)  ;;  %229 = vst [vmem:[%s1346_s4 + $0x18] sm:$0xff] (!%p829_p4), %v228_v3  ;;  %v234_v6 = vld [vmem:[%s1342_s0 + $0x30] sm:$0xff] (!%p829_p4) }
  0x11   : > { %231 = vst [vmem:[%s1346_s4 + $0x20] sm:$0xff] (!%p829_p4), %v230_v4  ;;  %233 = vst [vmem:[%s1346_s4 + $0x28] sm:$0xff] (!%p829_p4), %v232_v5  ;;  %v236_v7 = vld [vmem:[%s1342_s0 + $0x38] sm:$0xff] (!%p829_p4) }
  0x12   : > { %235 = vst [vmem:[%s1346_s4 + $0x30] sm:$0xff] (!%p829_p4), %v234_v6  ;;  %237 = vst [vmem:[%s1346_s4 + $0x38] sm:$0xff] (!%p829_p4), %v236_v7 }
  0x15   : > { %245 = vsyncadd [#allocation2], 1024 }
  0x16   : > { %1101 = dma.done.wait [#allocation2], 1024 }
  0x17   : > { %1102 = vsyncadd [#allocation2], 4294966272 }
  0x18 PF: > { %v1079_v8 = vld [vmem:[%s1155_s24] sm:$0xff]   ;;  %v1080_v9 = vld [vmem:[%s1155_s24 + $0x8] sm:$0xff]   ;;  %v1081_v10 = vld [vmem:[%s1155_s24 + $0x10] sm:$0xff]   ;;  %v1107_v24 = vmov 0.0|0.0   ;;  %vm1108_vm0 = vmmov 0   ;;  %v1109_v25 = vmov 0.0  }
  0x19   : > { %916 = vmatprep.subr.bf16.mxu0 %v1079_v8  ;;  %v1082_v11 = vld [vmem:[%s1155_s24 + $0x18] sm:$0xff]   ;;  %v1087_v12 = vld [vmem:[%s1346_s4] sm:$0xff]   ;;  %v1084_v14 = vld [vmem:[%s1155_s24 + $0x28] sm:$0xff]   ;;  %1018 = vmatprep.subr.bf16.mxu1 %v1107_v24 }
  0x1a   : > { %917 = vmatpush3.bf16.msra.mxu0 %v1079_v8  ;;  %932 = vmatprep.mubr.bf16.mxu0 %v1087_v12  ;;  %v1083_v13 = vld [vmem:[%s1155_s24 + $0x20] sm:$0xff]   ;;  %v1085_v15 = vld [vmem:[%s1155_s24 + $0x30] sm:$0xff]   ;;  %v1086_v16 = vld [vmem:[%s1155_s24 + $0x38] sm:$0xff]  }
  0x1b   : > { %918 = vmatprep.subr.bf16.mxu0 %v1080_v9  ;;  %v1088_v17 = vld [vmem:[%s1346_s4 + $0x8] sm:$0xff]   ;;  %v1089_v18 = vld [vmem:[%s1346_s4 + $0x10] sm:$0xff]   ;;  %v1090_v19 = vld [vmem:[%s1346_s4 + $0x18] sm:$0xff]   ;;  %980 = vmatprep.mubr.msk.f32.mxu1 %vm1108_vm0, %v1109_v25 }
  0x1c   : > { %v1091_v20 = vld [vmem:[%s1346_s4 + $0x20] sm:$0xff]   ;;  %v1092_v21 = vld [vmem:[%s1346_s4 + $0x28] sm:$0xff]   ;;  %v1093_v22 = vld [vmem:[%s1346_s4 + $0x30] sm:$0xff]  }
  0x1d   : > { %v1094_v23 = vld [vmem:[%s1346_s4 + $0x38] sm:$0xff]  }
  0x1e   : > { %919 = vmatpush3.bf16.msra.mxu0 %v1080_v9 }
  0x1f   : > { %920 = vmatprep.subr.bf16.mxu0 %v1081_v10 }
  0x22   : > { %921 = vmatpush3.bf16.msra.mxu0 %v1081_v10  ;;  %v1110_v10 = vmov 1.0  }
  0x23   : > { %922 = vmatprep.subr.bf16.mxu0 %v1082_v11 }
  0x26   : > { %923 = vmatpush3.bf16.msra.mxu0 %v1082_v11 }
  0x27   : > { %924 = vmatprep.subr.bf16.mxu0 %v1083_v13 }
  0x2a   : > { %925 = vmatpush3.bf16.msra.mxu0 %v1083_v13 }
  0x2b   : > { %926 = vmatprep.subr.bf16.mxu0 %v1084_v14 }
  0x2e   : > { %927 = vmatpush3.bf16.msra.mxu0 %v1084_v14 }
  0x2f   : > { %928 = vmatprep.subr.bf16.mxu0 %v1085_v15 }
  0x32   : > { %929 = vmatpush3.bf16.msra.mxu0 %v1085_v15 }
  0x33   : > { %930 = vmatprep.subr.bf16.mxu0 %v1086_v16 }
  0x36   : > { %931 = vmatpush3.bf16.msra.mxu0 %v1086_v16 }
  0x37   : > { %1042 = vmatprep.subr.bf16.mxu0 %v1107_v24 }
  0x39   : > { %933 = vmatmul.mubr.bf16.vlgmr.msra.gmra.mrb[0].mxu0 %v1088_v17 }
  0x3a   : > { %936 = vmatprep.mubr.bf16.mxu0 %v1089_v18 }
  0x41   : > { %937 = vmatmul.mubr.bf16.gmra.mrb[4].mxu0 %v1090_v19 }
  0x42   : > { %940 = vmatprep.mubr.bf16.mxu0 %v1091_v20 }
  0x49   : > { %941 = vmatmul.mubr.bf16.gmra.mrb[8].mxu0 %v1092_v21  ;;  %v655_v21 = vlaneseq }
  0x4a   : > { %944 = vmatprep.mubr.bf16.mxu0 %v1093_v22  ;;  %v636_v22 = vld [vmem:[%s181_s21] sm:$0x1] }
  0x51   : > { %945 = vmatmul.mubr.bf16.gmra.mrb[12].mxu0 %v1094_v23 }
  0x52   : > { %1015 = vmatprep.mubr.msk.f32.mxu0 %vm1108_vm0, %v1109_v25 }
 0x10c   : > { %v934_v26 = vpop.f32.mrb[0].mxu0 }
 0x10d   : > { %v412_v27 = vpop.f32.mrb[1].mxu0  ;;  %v547_v29 = vmul.f32 %v934_v26, %v934_v26 }
 0x10e   : > { %v935_v28 = vpop.f32.mrb[2].mxu0  ;;  %v545_v33 = vmul.f32 %v412_v27, %v412_v27 }
 0x10f   : > { %v1243_v30 = vpack.c.bf16 %v935_v28, %v934_v26  ;;  %v548_v31 = vmul.f32 %v935_v28, %v935_v28  ;;  %v415_v32 = vpop.f32.mrb[3].mxu0  ;;  %v640_v26 = vld [vmem:[%s184_s27] sm:$0x1] }
 0x110   : > { %v546_v34 = vmul.f32 %v415_v32, %v415_v32  ;;  %v1245_v35 = vpack.c.bf16 %v415_v32, %v412_v27 }
 0x111   : > { %v1046_v36 = vpack.c.bf16 %v548_v31, %v547_v29 }
 0x112   : > { %v1043_v37 = vpack.c.bf16 %v546_v34, %v545_v33  ;;  %1020 = vmatpush3.bf16.msra.mxu1 %v1245_v35 }
 0x113   : > { %1021 = vmatprep.subr.bf16.mxu1 %v1107_v24 }
 0x114   : > { %v938_v38 = vpop.f32.mrb[4].mxu0  ;;  %1044 = vmatpush3.bf16.msra.mxu0 %v1043_v37 }
 0x115   : > { %v428_v39 = vpop.f32.mrb[5].mxu0  ;;  %1045 = vmatprep.subr.bf16.mxu0 %v1107_v24  ;;  %v551_v41 = vmul.f32 %v938_v38, %v938_v38 }
 0x116   : > { %v939_v40 = vpop.f32.mrb[6].mxu0  ;;  %1023 = vmatpush3.bf16.msra.mxu1 %v1243_v30  ;;  %v549_v45 = vmul.f32 %v428_v39, %v428_v39 }
 0x117   : > { %v1251_v42 = vpack.c.bf16 %v939_v40, %v938_v38  ;;  %v552_v43 = vmul.f32 %v939_v40, %v939_v40  ;;  %v431_v44 = vpop.f32.mrb[7].mxu0  ;;  %1024 = vmatprep.subr.bf16.mxu1 %v1107_v24 }
 0x118   : > { %v1254_v46 = vpack.c.bf16 %v431_v44, %v428_v39  ;;  %v550_v47 = vmul.f32 %v431_v44, %v431_v44  ;;  %1047 = vmatpush3.bf16.msra.mxu0 %v1046_v36 }
 0x119   : > { %v1052_v48 = vpack.c.bf16 %v552_v43, %v551_v41  ;;  %1048 = vmatprep.subr.bf16.mxu0 %v1107_v24 }
 0x11a   : > { %v1049_v49 = vpack.c.bf16 %v550_v47, %v549_v45  ;;  %1026 = vmatpush3.bf16.msra.mxu1 %v1254_v46 }
 0x11b   : > { %1027 = vmatprep.subr.bf16.mxu1 %v1107_v24 }
 0x11c   : > { %v942_v50 = vpop.f32.mrb[8].mxu0  ;;  %1050 = vmatpush3.bf16.msra.mxu0 %v1049_v49 }
 0x11d   : > { %v444_v51 = vpop.f32.mrb[9].mxu0  ;;  %1051 = vmatprep.subr.bf16.mxu0 %v1107_v24  ;;  %v555_v53 = vmul.f32 %v942_v50, %v942_v50 }
 0x11e   : > { %v943_v52 = vpop.f32.mrb[10].mxu0  ;;  %1029 = vmatpush3.bf16.msra.mxu1 %v1251_v42  ;;  %v553_v57 = vmul.f32 %v444_v51, %v444_v51 }
 0x11f   : > { %v1261_v54 = vpack.c.bf16 %v943_v52, %v942_v50  ;;  %v556_v55 = vmul.f32 %v943_v52, %v943_v52  ;;  %v447_v56 = vpop.f32.mrb[11].mxu0  ;;  %1030 = vmatprep.subr.bf16.mxu1 %v1107_v24 }
 0x120   : > { %v1264_v58 = vpack.c.bf16 %v447_v56, %v444_v51  ;;  %v554_v59 = vmul.f32 %v447_v56, %v447_v56  ;;  %1053 = vmatpush3.bf16.msra.mxu0 %v1052_v48 }
 0x121   : > { %v1058_v60 = vpack.c.bf16 %v556_v55, %v555_v53  ;;  %1054 = vmatprep.subr.bf16.mxu0 %v1107_v24 }
 0x122   : > { %v1055_v61 = vpack.c.bf16 %v554_v59, %v553_v57  ;;  %1032 = vmatpush3.bf16.msra.mxu1 %v1264_v58 }
 0x123   : > { %1033 = vmatprep.subr.bf16.mxu1 %v1107_v24 }
 0x124   : > { %v946_v62 = vpop.f32.mrb[12].mxu0  ;;  %1056 = vmatpush3.bf16.msra.mxu0 %v1055_v61 }
 0x125   : > { %v460_v63 = vpop.f32.mrb[13].mxu0  ;;  %1057 = vmatprep.subr.bf16.mxu0 %v1107_v24  ;;  %v559_v1 = vmul.f32 %v946_v62, %v946_v62 }
 0x126   : > { %v947_v0 = vpop.f32.mrb[14].mxu0  ;;  %1035 = vmatpush3.bf16.msra.mxu1 %v1261_v54  ;;  %v557_v5 = vmul.f32 %v460_v63, %v460_v63 }
 0x127   : > { %v1040_v2 = vpack.c.bf16 %v947_v0, %v946_v62  ;;  %v560_v3 = vmul.f32 %v947_v0, %v947_v0  ;;  %v463_v4 = vpop.f32.mrb[15].mxu0  ;;  %1036 = vmatprep.subr.bf16.mxu1 %v1107_v24 }
 0x128   : > { %v1037_v6 = vpack.c.bf16 %v463_v4, %v460_v63  ;;  %v558_v7 = vmul.f32 %v463_v4, %v463_v4  ;;  %1059 = vmatpush3.bf16.msra.mxu0 %v1058_v60 }
 0x129   : > { %v1064_v8 = vpack.c.bf16 %v560_v3, %v559_v1  ;;  %1060 = vmatprep.subr.bf16.mxu0 %v1107_v24 }
 0x12a   : > { %v1061_v9 = vpack.c.bf16 %v558_v7, %v557_v5  ;;  %1038 = vmatpush3.bf16.msra.mxu1 %v1037_v6 }
 0x12b   : > { %1039 = vmatprep.subr.bf16.mxu1 %v1107_v24 }
 0x12c   : > { %1062 = vmatpush3.bf16.msra.mxu0 %v1061_v9 }
 0x12d   : > { %1063 = vmatprep.subr.bf16.mxu0 %v1107_v24  ;;  %v656_v24 = vshrl.u32 %v655_v21, 7 }
 0x12e   : > { %1041 = vmatpush3.bf16.msra.mxu1 %v1040_v2 }
 0x12f   : > { %v657_v29 = vsub.s32 0, %v656_v24 }
 0x130   : > { %1065 = vmatpush3.bf16.msra.mxu0 %v1064_v8 }
 0x131   : > { %981 = vmatmul.mubr.f32.vlgmr.msra.gmra.mrb[0].mxu1 %v1110_v10 }
 0x133   : > { %1016 = vmatmul.mubr.f32.vlgmr.msra.gmra.mrb[16].mxu0 %v1110_v10 }
 0x204   : > { %v541_v11 = vpop.f32.mrb[0].mxu1 }
 0x205   : > { %v631_v12 = vmul.f32 0.0078125, %v541_v11  ;;  %v982_v13 = vpop.f32.mrb[1].mxu1 }
 0x206   : > { %v627_v14 = vpop.f32.mrb[16].mxu0 }
 0x207   : > { %v633_v15 = vmul.f32 %v631_v12, %v631_v12  ;;  %v632_v16 = vmul.f32 0.0078125, %v627_v14  ;;  %v1017_v17 = vpop.f32.mrb[17].mxu0 }
 0x209   : > { %v634_v18 = vsub.f32 %v632_v16, %v633_v15 }
 0x20b   : > { %v635_v19 = vmax.f32 %v634_v18, 0.0 }
 0x20d   : > { %v637_v20 = vadd.f32 1e-05, %v635_v19 }
 0x20f   : > { %1095 = vrsqrt.f32 %v637_v20 }
 0x219   : > { %v1096_v23 = vpop.eup %1095 }
 0x21a   : > { %v639_v25 = vmul.f32 %v1096_v23, %v636_v22 }
 0x21c   : > { %v641_v27 = vmul.f32 %v639_v25, %v631_v12  ;;  %v651_v28 = vpack.c.bf16 %v639_v25, %v639_v25 }
 0x21e   : > { %v642_v31 = vsub.f32 %v640_v26, %v641_v27  ;;  %v653_v32 = vpack.i.b16 %v651_v28, %v651_v28 }
 0x220   : > { %v667_v33 = vpack.c.bf16 %v642_v31, %v642_v31  ;;  %v658_v34 = vrot.slane %v653_v32, %v657_v29 }
 0x222   : > { %v669_v36 = vpack.i.b16 %v667_v33, %v667_v33  ;;  %v659_v37 = vmul.bf16 %v1245_v35, %v658_v34  ;;  %v660_v38 = vmul.bf16 %v1243_v30, %v658_v34  ;;  %v661_v39 = vmul.bf16 %v1254_v46, %v658_v34 }
 0x223   : > { %v662_v40 = vmul.bf16 %v1251_v42, %v658_v34  ;;  %v663_v43 = vmul.bf16 %v1264_v58, %v658_v34  ;;  %v664_v44 = vmul.bf16 %v1261_v54, %v658_v34  ;;  %v665_v45 = vmul.bf16 %v1037_v6, %v658_v34 }
 0x224   : > { %v674_v41 = vrot.slane %v669_v36, %v657_v29  ;;  %v666_v47 = vmul.bf16 %v1040_v2, %v658_v34  ;;  %v1111_v30 = vmov 0  }
 0x226   : > { %v675_v48 = vadd.bf16 %v674_v41, %v659_v37  ;;  %v676_v49 = vadd.bf16 %v674_v41, %v660_v38  ;;  %v677_v50 = vadd.bf16 %v674_v41, %v661_v39  ;;  %v678_v51 = vadd.bf16 %v674_v41, %v662_v40 }
 0x227   : > { %v679_v52 = vadd.bf16 %v674_v41, %v663_v43  ;;  %v680_v53 = vadd.bf16 %v674_v41, %v664_v44  ;;  %v681_v35 = vadd.bf16 %v674_v41, %v665_v45  ;;  %v682_v55 = vadd.bf16 %v674_v41, %v666_v47 }
 0x228   : > { %v683_v56 = vmax.bf16 %v1111_v30, %v675_v48  ;;  %v684_v46 = vmax.bf16 %v1111_v30, %v676_v49  ;;  %v685_v57 = vmax.bf16 %v1111_v30, %v677_v50  ;;  %v686_v42 = vmax.bf16 %v1111_v30, %v678_v51 }
 0x229   : > { %v687_v59 = vmax.bf16 %v1111_v30, %v679_v52  ;;  %v688_v60 = vmax.bf16 %v1111_v30, %v680_v53  ;;  %v689_v58 = vmax.bf16 %v1111_v30, %v681_v35  ;;  %v690_v61 = vmax.bf16 %v1111_v30, %v682_v55 }
 0x22a   : > { %v846_v54 = vcombine.low %v683_v56, %v683_v56  ;;  %v847_v62 = vcombine.high %v683_v56, %v683_v56  ;;  %v848_v63 = vcombine.low %v684_v46, %v684_v46  ;;  %v849_v0 = vcombine.high %v684_v46, %v684_v46 }
 0x22b   : > { %v850_v1 = vcombine.low %v685_v57, %v685_v57  ;;  %v851_v2 = vcombine.high %v685_v57, %v685_v57  ;;  %v852_v3 = vcombine.low %v686_v42, %v686_v42  ;;  %v853_v4 = vcombine.high %v686_v42, %v686_v42 }
 0x22c   : > { %v854_v5 = vcombine.low %v687_v59, %v687_v59  ;;  %v855_v6 = vcombine.high %v687_v59, %v687_v59  ;;  %v856_v7 = vcombine.low %v688_v60, %v688_v60  ;;  %v857_v8 = vcombine.high %v688_v60, %v688_v60  ;;  %747 = vst [vmem:[%s1346_s4] sm:$0xf] %v846_v54 }
 0x22d   : > { %748 = vst [vmem:[%s1346_s4 + $0x4] sm:$0xf] %v847_v62  ;;  %749 = vst [vmem:[%s1346_s4 + $0x8] sm:$0xf] %v848_v63  ;;  %v858_v9 = vcombine.low %v689_v58, %v689_v58  ;;  %v859_v10 = vcombine.high %v689_v58, %v689_v58  ;;  %v860_v11 = vcombine.low %v690_v61, %v690_v61 }
 0x22e   : > { %750 = vst [vmem:[%s1346_s4 + $0xc] sm:$0xf] %v849_v0  ;;  %v861_v12 = vcombine.high %v690_v61, %v690_v61  ;;  %751 = vst [vmem:[%s1346_s4 + $0x10] sm:$0xf] %v850_v1 }
 0x22f   : > { %752 = vst [vmem:[%s1346_s4 + $0x14] sm:$0xf] %v851_v2  ;;  %753 = vst [vmem:[%s1346_s4 + $0x18] sm:$0xf] %v852_v3 }
 0x230   : > { %754 = vst [vmem:[%s1346_s4 + $0x1c] sm:$0xf] %v853_v4  ;;  %755 = vst [vmem:[%s1346_s4 + $0x20] sm:$0xf] %v854_v5 }
 0x231   : > { %756 = vst [vmem:[%s1346_s4 + $0x24] sm:$0xf] %v855_v6  ;;  %757 = vst [vmem:[%s1346_s4 + $0x28] sm:$0xf] %v856_v7 }
 0x232   : > { %758 = vst [vmem:[%s1346_s4 + $0x2c] sm:$0xf] %v857_v8  ;;  %759 = vst [vmem:[%s1346_s4 + $0x30] sm:$0xf] %v858_v9 }
 0x233   : > { %760 = vst [vmem:[%s1346_s4 + $0x34] sm:$0xf] %v859_v10  ;;  %761 = vst [vmem:[%s1346_s4 + $0x38] sm:$0xf] %v860_v11 }
 0x234   : > { %762 = vst [vmem:[%s1346_s4 + $0x3c] sm:$0xf] %v861_v12 }
 0x235 PF: > { %s14_s15 = sadd.s32 1, %s1105_s15  }
 0x236   : > { %p11_p5 = scmp.ge.s32.totalorder %s14_s15, 4  }
 0x238   :  { %13 = sbr.rel (!%p11_p5) target bundleno = 1 (0x1), region = 110 }
 0x23f   :  { %774 = vsyncmov [#allocation2] }
 0x242   :  { %s775_s16 = vpop.sfrf %774 }
 0x243   :  { %p864_p6 = scmp.ne.s32.totalorder %s775_s16, 0 }
 0x245   :  { %779 = shalt.err (%p864_p6)  }

</bundles_post_ra>
